<compile_context>
chip_gen: v7x
topology: tpu7x:2x2x1
jax: 0.10.0
libtpu: 0.0.40
codegen_flags: <defaults>
</compile_context>

<pallas_src>
import functools

import numpy as np

import jax
import jax.numpy as jnp
from jax import lax
from jax.experimental import pallas as pl
from jax.experimental.pallas import tpu as pltpu


def _double_conv_kernel(mask_ref, x_ref, w1_ref, sh1_ref, w2_ref, sh2_ref,
                        o_ref, *, img_w):
    """One batch-block (nb images) per grid step.

    mask_ref: (9, M)         f32; 1.0 where tap k's source pixel is in-bounds
    x_ref   : (nb, Cin, M)   images, channel-major, flat spatial (M=H*W) on lanes
    w1_ref  : (Cout, 9*Cin)  conv1 weights * BN1 scale, column = (3*ky+kx)*Cin + c
    sh1_ref : (Cout, 1)      conv1 bias + BN1 shift, f32
    w2_ref  : (Cout, 9*Cout) conv2 weights * BN2 scale
    sh2_ref : (Cout, 1)      conv2 bias + BN2 shift, f32
    o_ref   : (nb, Cout, M)  f32 output, lane-dense (M % 128 == 0)
    """
    nb, _, m = x_ref.shape
    mxu_dt = w1_ref.dtype

    # Border-validity masks, one (1, M) row per tap.  Hoisted once; reused by
    # both convs and all nb images.
    mask = mask_ref[...]
    valid = [mask[k:k + 1, :] > 0.0 for k in range(9)]

    def im2col(a):
        # a: (C, M) f32, one image.  Tap (ky,kx) of the padding=1 conv is the
        # image rolled by (ky-1)*W + (kx-1) along the flat lane axis; positions
        # whose source pixel falls outside the image (including every roll
        # wrap-around) are zeroed by the precomputed border mask.
        taps = []
        for k in range(9):
            dy, dx = k // 3 - 1, k % 3 - 1
            delta = dy * img_w + dx
            r = a if delta == 0 else pltpu.roll(a, (-delta) % m, axis=1)
            taps.append(jnp.where(valid[k], r, 0.0))
        return jnp.concatenate(taps, axis=0)                  # (9*C, M)

    def shift_elu(acc, sh_ref):
        # BN scale already folded into the weights; only shift + ELU here.
        z = acc + sh_ref[...]
        # TODO(synk): switch to expm1 for last-bit ELU accuracy near 0-.
        return jnp.where(z > 0.0, z, jnp.exp(jnp.minimum(z, 0.0)) - 1.0)

    # ---- conv1 -> BN -> ELU: one MXU matmul, lane-dense (Cout, nb*M) result ----
    p1 = [im2col(x_ref[i].astype(jnp.float32)) for i in range(nb)]
    p1 = p1[0] if nb == 1 else jnp.concatenate(p1, axis=1)    # (9*Cin, nb*M)
    acc1 = jnp.dot(w1_ref[...], p1.astype(mxu_dt),
                   preferred_element_type=jnp.float32)
    z1 = shift_elu(acc1, sh1_ref)                             # (Cout, nb*M) f32

    # ---- conv2 -> BN -> ELU (taps built from f32 activation; cast only at the dot) ----
    p2 = [im2col(z1[:, i * m:(i + 1) * m]) for i in range(nb)]
    p2 = p2[0] if nb == 1 else jnp.concatenate(p2, axis=1)    # (9*Cout, nb*M)
    acc2 = jnp.dot(w2_ref[...], p2.astype(mxu_dt),
                   preferred_element_type=jnp.float32)
    z2 = shift_elu(acc2, sh2_ref)                             # (Cout, nb*M) f32

    # Per-image stores: (Cout, M) slabs, unmasked (M % 128 == 0, Cout == 8).
    for i in range(nb):
        o_ref[i] = z2[:, i * m:(i + 1) * m].astype(o_ref.dtype)


@functools.partial(jax.jit, static_argnames=("mxu_dtype", "nb"))
def inconv_forward(x_nchw, params, *, mxu_dtype=jnp.float32, nb=1):
    """InConv.forward (no_padding=False): (N, Cin, H, W) -> (N, Cout, H, W).  Eval-mode BN."""
    N, Cin, H, W = x_nchw.shape
    Cout = params["w1"].shape[0]
    M = H * W
    eps = 1e-5
    assert N % nb == 0, "nb must divide the batch size"
    # Prefer N // nb >= 2 so both v7x TensorCores receive grid steps.

    # Free reshape only (NCHW is already channel-major / spatial-minor); astype
    # is a no-op at the default mxu_dtype=f32 — no extra wrapper HBM passes.
    x = x_nchw.reshape(N, Cin, M).astype(mxu_dtype)

    def fold(wc, b, g, beta, mu, var):
        # BN(conv(x, W) + b) == conv(x, s*W) + (s*(b - mu) + beta), s = g/sqrt(var+eps)
        s = g / jnp.sqrt(var + eps)
        w_eff = wc * s[:, None, None, None]                               # (O, I, 3, 3)
        shift = beta + s * (b - mu)                                       # (O,)
        # (O, I, 3, 3) -> (O, 3, 3, I) -> (O, 9*I): column = (3*ky + kx)*I + c,
        # matching the kernel's tap-major / channel-minor patch row order.
        wf = jnp.transpose(w_eff, (0, 2, 3, 1)).reshape(wc.shape[0], -1)
        return wf.astype(mxu_dtype), shift.reshape(-1, 1).astype(jnp.float32)

    w1f, sh1 = fold(params["w1"], params["b1"], params["g1"],
                    params["beta1"], params["m1"], params["v1"])
    w2f, sh2 = fold(params["w2"], params["b2"], params["g2"],
                    params["beta2"], params["m2"], params["v2"])

    # Static border masks (padding=1): one (1, M) row per tap, 1.0 where the
    # tap's source pixel is inside the image.  Compile-time constant (numpy).
    yy = np.arange(H)[:, None]
    xx = np.arange(W)[None, :]
    rows = []
    for k in range(9):
        dy, dx = k // 3 - 1, k % 3 - 1
        ok = (yy + dy >= 0) & (yy + dy < H) & (xx + dx >= 0) & (xx + dx < W)
        rows.append(ok.reshape(1, M))
    mask = jnp.asarray(np.concatenate(rows, axis=0).astype(np.float32))    # (9, M)

    grid_spec = pltpu.PrefetchScalarGridSpec(
        num_scalar_prefetch=0,
        grid=(N // nb,),
        in_specs=[
            pl.BlockSpec((9, M), lambda b: (0, 0)),            # border masks (resident)
            pl.BlockSpec((nb, Cin, M), lambda b: (b, 0, 0)),   # images, lane-dense
            pl.BlockSpec((Cout, 9 * Cin), lambda b: (0, 0)),
            pl.BlockSpec((Cout, 1), lambda b: (0, 0)),
            pl.BlockSpec((Cout, 9 * Cout), lambda b: (0, 0)),
            pl.BlockSpec((Cout, 1), lambda b: (0, 0)),
        ],
        out_specs=pl.BlockSpec((nb, Cout, M), lambda b: (b, 0, 0)),
    )

    out = pl.pallas_call(
        functools.partial(_double_conv_kernel, img_w=W),
        out_shape=jax.ShapeDtypeStruct((N, Cout, M), jnp.float32),
        grid_spec=grid_spec,
        compiler_params=pltpu.CompilerParams(
            dimension_semantics=("parallel",),
            # Tiny usage at these shapes; re-derive with the row-strip tiling for
            # real resolutions (v7x: 64 MiB physical, v5e scoped default 16 MiB).
            vmem_limit_bytes=32 * 1024 * 1024,
        ),
    )(mask, x, w1f, sh1, w2f, sh2)

    # Free reshape back to NCHW.
    return out.reshape(N, Cout, H, W)


def reference_nchw(x, params):
    """Pure-JAX reference of InConv.forward (eval-mode BN), NCHW, padding=1."""
    eps = 1e-5

    def block(y, wc, b, g, beta, m, v):
        y = lax.conv_general_dilated(
            y, wc, window_strides=(1, 1), padding=((1, 1), (1, 1)),
            dimension_numbers=("NCHW", "OIHW", "NCHW"),
            precision=lax.Precision.HIGHEST)
        y = y + b[None, :, None, None]
        y = (g[None, :, None, None] * (y - m[None, :, None, None])
             / jnp.sqrt(v[None, :, None, None] + eps) + beta[None, :, None, None])
        return jnp.where(y > 0, y, jnp.exp(jnp.minimum(y, 0.0)) - 1.0)

    y = block(x, params["w1"], params["b1"], params["g1"],
              params["beta1"], params["m1"], params["v1"])
    y = block(y, params["w2"], params["b2"], params["g2"],
              params["beta2"], params["m2"], params["v2"])
    return y


if __name__ == "__main__":
    key = jax.random.PRNGKey(0)
    N, Cin, H, W = 2, 4, 16, 16
    Cout = 8
    ks = jax.random.split(key, 13)

    x = jax.random.normal(ks[0], (N, Cin, H, W), jnp.float32)
    params = {
        "w1": jax.random.normal(ks[1], (Cout, Cin, 3, 3), jnp.float32) * 0.2,
        "b1": jax.random.normal(ks[2], (Cout,), jnp.float32) * 0.1,
        "g1": jax.random.uniform(ks[3], (Cout,), jnp.float32, 0.5, 1.5),
        "beta1": jax.random.normal(ks[4], (Cout,), jnp.float32) * 0.1,
        "m1": jax.random.normal(ks[5], (Cout,), jnp.float32) * 0.1,
        "v1": jax.random.uniform(ks[6], (Cout,), jnp.float32, 0.5, 1.5),
        "w2": jax.random.normal(ks[7], (Cout, Cout, 3, 3), jnp.float32) * 0.2,
        "b2": jax.random.normal(ks[8], (Cout,), jnp.float32) * 0.1,
        "g2": jax.random.uniform(ks[9], (Cout,), jnp.float32, 0.5, 1.5),
        "beta2": jax.random.normal(ks[10], (Cout,), jnp.float32) * 0.1,
        "m2": jax.random.normal(ks[11], (Cout,), jnp.float32) * 0.1,
        "v2": jax.random.uniform(ks[12], (Cout,), jnp.float32, 0.5, 1.5),
    }

    ref = reference_nchw(x, params)

    # f32 MXU-operand path, nb=1 (2 grid steps -> both v7x TCs): strict check.
    out = jax.block_until_ready(inconv_forward(x, params))
    assert out.shape == (N, Cout, H, W), out.shape
    err = float(jnp.max(jnp.abs(out - ref)))
    assert jnp.allclose(out, ref, atol=5e-4, rtol=5e-4), f"f32 nb=1 max abs err = {err}"

    # nb=2 path: both images folded into one matmul (M = 512 lanes per pass).
    out_nb2 = jax.block_until_ready(inconv_forward(x, params, nb=2))
    err2 = float(jnp.max(jnp.abs(out_nb2 - ref)))
    assert jnp.allclose(out_nb2, ref, atol=5e-4, rtol=5e-4), f"f32 nb=2 max abs err = {err2}"

    # bf16 MXU-operand path (halves input DMA; compute/masks stay f32): loose check.
    out_bf16 = jax.block_until_ready(
        inconv_forward(x, params, mxu_dtype=jnp.bfloat16))
    err_bf16 = float(jnp.max(jnp.abs(out_bf16 - ref)))
    assert jnp.allclose(out_bf16, ref, atol=5e-1, rtol=5e-2), \
        f"bf16 max abs err = {err_bf16}"

    print("KERNEL_OK")
</pallas_src>

<mosaic_0001>
module attributes {stable_mosaic.version = 11 : i64} {
  func.func @_double_conv_kernel(%arg0: i32, %arg1: memref<9x256xf32, #tpu.memory_space<vmem>>, %arg2: memref<1x4x256xf32, #tpu.memory_space<vmem>>, %arg3: memref<8x36xf32, #tpu.memory_space<vmem>>, %arg4: memref<8x1xf32, #tpu.memory_space<vmem>>, %arg5: memref<8x72xf32, #tpu.memory_space<vmem>>, %arg6: memref<8x1xf32, #tpu.memory_space<vmem>>, %arg7: memref<1x8x256xf32, #tpu.memory_space<vmem>>) attributes {dimension_semantics = [#tpu.dimension_semantics<parallel>], iteration_bounds = array<i64: 2>, scalar_prefetch = 0 : i64, scratch_operands = 0 : i64, tpu.core_type = #tpu.core_type<tc>, window_params = [{pipeline_mode = #tpu.pipeline_mode<synchronous>, transform_indices = @transform_0, window_bounds = array<i64: 9, 256>}, {transform_indices = @transform_1, window_bounds = array<i64: 1, 4, 256>}, {pipeline_mode = #tpu.pipeline_mode<synchronous>, transform_indices = @transform_2, window_bounds = array<i64: 8, 36>}, {pipeline_mode = #tpu.pipeline_mode<synchronous>, transform_indices = @transform_3, window_bounds = array<i64: 8, 1>}, {pipeline_mode = #tpu.pipeline_mode<synchronous>, transform_indices = @transform_4, window_bounds = array<i64: 8, 72>}, {pipeline_mode = #tpu.pipeline_mode<synchronous>, transform_indices = @transform_5, window_bounds = array<i64: 8, 1>}, {transform_indices = @transform_6, window_bounds = array<i64: 1, 8, 256>}]} {
    %c0 = arith.constant 0 : index
    %c0_0 = arith.constant 0 : index
    %0 = vector.load %arg1[%c0, %c0_0] : memref<9x256xf32, #tpu.memory_space<vmem>>, vector<9x256xf32>
    %1 = vector.extract_strided_slice %0 {offsets = [0, 0], sizes = [1, 256], strides = [1, 1]} : vector<9x256xf32> to vector<1x256xf32>
    %cst = arith.constant 0.000000e+00 : f32
    %2 = vector.broadcast %cst : f32 to vector<1x256xf32>
    %3 = arith.cmpf ogt, %1, %2 : vector<1x256xf32>
    %4 = vector.extract_strided_slice %0 {offsets = [1, 0], sizes = [1, 256], strides = [1, 1]} : vector<9x256xf32> to vector<1x256xf32>
    %cst_1 = arith.constant 0.000000e+00 : f32
    %5 = vector.broadcast %cst_1 : f32 to vector<1x256xf32>
    %6 = arith.cmpf ogt, %4, %5 : vector<1x256xf32>
    %7 = vector.extract_strided_slice %0 {offsets = [2, 0], sizes = [1, 256], strides = [1, 1]} : vector<9x256xf32> to vector<1x256xf32>
    %cst_2 = arith.constant 0.000000e+00 : f32
    %8 = vector.broadcast %cst_2 : f32 to vector<1x256xf32>
    %9 = arith.cmpf ogt, %7, %8 : vector<1x256xf32>
    %10 = vector.extract_strided_slice %0 {offsets = [3, 0], sizes = [1, 256], strides = [1, 1]} : vector<9x256xf32> to vector<1x256xf32>
    %cst_3 = arith.constant 0.000000e+00 : f32
    %11 = vector.broadcast %cst_3 : f32 to vector<1x256xf32>
    %12 = arith.cmpf ogt, %10, %11 : vector<1x256xf32>
    %13 = vector.extract_strided_slice %0 {offsets = [4, 0], sizes = [1, 256], strides = [1, 1]} : vector<9x256xf32> to vector<1x256xf32>
    %cst_4 = arith.constant 0.000000e+00 : f32
    %14 = vector.broadcast %cst_4 : f32 to vector<1x256xf32>
    %15 = arith.cmpf ogt, %13, %14 : vector<1x256xf32>
    %16 = vector.extract_strided_slice %0 {offsets = [5, 0], sizes = [1, 256], strides = [1, 1]} : vector<9x256xf32> to vector<1x256xf32>
    %cst_5 = arith.constant 0.000000e+00 : f32
    %17 = vector.broadcast %cst_5 : f32 to vector<1x256xf32>
    %18 = arith.cmpf ogt, %16, %17 : vector<1x256xf32>
    %19 = vector.extract_strided_slice %0 {offsets = [6, 0], sizes = [1, 256], strides = [1, 1]} : vector<9x256xf32> to vector<1x256xf32>
    %cst_6 = arith.constant 0.000000e+00 : f32
    %20 = vector.broadcast %cst_6 : f32 to vector<1x256xf32>
    %21 = arith.cmpf ogt, %19, %20 : vector<1x256xf32>
    %22 = vector.extract_strided_slice %0 {offsets = [7, 0], sizes = [1, 256], strides = [1, 1]} : vector<9x256xf32> to vector<1x256xf32>
    %cst_7 = arith.constant 0.000000e+00 : f32
    %23 = vector.broadcast %cst_7 : f32 to vector<1x256xf32>
    %24 = arith.cmpf ogt, %22, %23 : vector<1x256xf32>
    %25 = vector.extract_strided_slice %0 {offsets = [8, 0], sizes = [1, 256], strides = [1, 1]} : vector<9x256xf32> to vector<1x256xf32>
    %cst_8 = arith.constant 0.000000e+00 : f32
    %26 = vector.broadcast %cst_8 : f32 to vector<1x256xf32>
    %27 = arith.cmpf ogt, %25, %26 : vector<1x256xf32>
    %c0_9 = arith.constant 0 : index
    %c0_10 = arith.constant 0 : index
    %c0_11 = arith.constant 0 : index
    %28 = vector.load %arg2[%c0_9, %c0_10, %c0_11] : memref<1x4x256xf32, #tpu.memory_space<vmem>>, vector<1x4x256xf32>
    %29 = vector.shape_cast %28 : vector<1x4x256xf32> to vector<4x256xf32>
    %c17_i32 = arith.constant 17 : i32
    %30 = tpu.dynamic_rotate %29 by %c17_i32 dim 1 : vector<4x256xf32>, i32 -> vector<4x256xf32>
    %cst_12 = arith.constant 0.000000e+00 : f32
    %31 = vector.shape_cast %3 : vector<1x256xi1> to vector<1x256xi1>
    %32 = vector.broadcast %31 : vector<1x256xi1> to vector<4x256xi1>
    %33 = vector.broadcast %cst_12 : f32 to vector<4x256xf32>
    %34 = arith.select %32, %30, %33 : vector<4x256xi1>, vector<4x256xf32>
    %c16_i32 = arith.constant 16 : i32
    %35 = tpu.dynamic_rotate %29 by %c16_i32 dim 1 : vector<4x256xf32>, i32 -> vector<4x256xf32>
    %cst_13 = arith.constant 0.000000e+00 : f32
    %36 = vector.shape_cast %6 : vector<1x256xi1> to vector<1x256xi1>
    %37 = vector.broadcast %36 : vector<1x256xi1> to vector<4x256xi1>
    %38 = vector.broadcast %cst_13 : f32 to vector<4x256xf32>
    %39 = arith.select %37, %35, %38 : vector<4x256xi1>, vector<4x256xf32>
    %c15_i32 = arith.constant 15 : i32
    %40 = tpu.dynamic_rotate %29 by %c15_i32 dim 1 : vector<4x256xf32>, i32 -> vector<4x256xf32>
    %cst_14 = arith.constant 0.000000e+00 : f32
    %41 = vector.shape_cast %9 : vector<1x256xi1> to vector<1x256xi1>
    %42 = vector.broadcast %41 : vector<1x256xi1> to vector<4x256xi1>
    %43 = vector.broadcast %cst_14 : f32 to vector<4x256xf32>
    %44 = arith.select %42, %40, %43 : vector<4x256xi1>, vector<4x256xf32>
    %c1_i32 = arith.constant 1 : i32
    %45 = tpu.dynamic_rotate %29 by %c1_i32 dim 1 : vector<4x256xf32>, i32 -> vector<4x256xf32>
    %cst_15 = arith.constant 0.000000e+00 : f32
    %46 = vector.shape_cast %12 : vector<1x256xi1> to vector<1x256xi1>
    %47 = vector.broadcast %46 : vector<1x256xi1> to vector<4x256xi1>
    %48 = vector.broadcast %cst_15 : f32 to vector<4x256xf32>
    %49 = arith.select %47, %45, %48 : vector<4x256xi1>, vector<4x256xf32>
    %cst_16 = arith.constant 0.000000e+00 : f32
    %50 = vector.shape_cast %15 : vector<1x256xi1> to vector<1x256xi1>
    %51 = vector.broadcast %50 : vector<1x256xi1> to vector<4x256xi1>
    %52 = vector.broadcast %cst_16 : f32 to vector<4x256xf32>
    %53 = arith.select %51, %29, %52 : vector<4x256xi1>, vector<4x256xf32>
    %c255_i32 = arith.constant 255 : i32
    %54 = tpu.dynamic_rotate %29 by %c255_i32 dim 1 : vector<4x256xf32>, i32 -> vector<4x256xf32>
    %cst_17 = arith.constant 0.000000e+00 : f32
    %55 = vector.shape_cast %18 : vector<1x256xi1> to vector<1x256xi1>
    %56 = vector.broadcast %55 : vector<1x256xi1> to vector<4x256xi1>
    %57 = vector.broadcast %cst_17 : f32 to vector<4x256xf32>
    %58 = arith.select %56, %54, %57 : vector<4x256xi1>, vector<4x256xf32>
    %c241_i32 = arith.constant 241 : i32
    %59 = tpu.dynamic_rotate %29 by %c241_i32 dim 1 : vector<4x256xf32>, i32 -> vector<4x256xf32>
    %cst_18 = arith.constant 0.000000e+00 : f32
    %60 = vector.shape_cast %21 : vector<1x256xi1> to vector<1x256xi1>
    %61 = vector.broadcast %60 : vector<1x256xi1> to vector<4x256xi1>
    %62 = vector.broadcast %cst_18 : f32 to vector<4x256xf32>
    %63 = arith.select %61, %59, %62 : vector<4x256xi1>, vector<4x256xf32>
    %c240_i32 = arith.constant 240 : i32
    %64 = tpu.dynamic_rotate %29 by %c240_i32 dim 1 : vector<4x256xf32>, i32 -> vector<4x256xf32>
    %cst_19 = arith.constant 0.000000e+00 : f32
    %65 = vector.shape_cast %24 : vector<1x256xi1> to vector<1x256xi1>
    %66 = vector.broadcast %65 : vector<1x256xi1> to vector<4x256xi1>
    %67 = vector.broadcast %cst_19 : f32 to vector<4x256xf32>
    %68 = arith.select %66, %64, %67 : vector<4x256xi1>, vector<4x256xf32>
    %c239_i32 = arith.constant 239 : i32
    %69 = tpu.dynamic_rotate %29 by %c239_i32 dim 1 : vector<4x256xf32>, i32 -> vector<4x256xf32>
    %cst_20 = arith.constant 0.000000e+00 : f32
    %70 = vector.shape_cast %27 : vector<1x256xi1> to vector<1x256xi1>
    %71 = vector.broadcast %70 : vector<1x256xi1> to vector<4x256xi1>
    %72 = vector.broadcast %cst_20 : f32 to vector<4x256xf32>
    %73 = arith.select %71, %69, %72 : vector<4x256xi1>, vector<4x256xf32>
    %74 = tpu.concatenate %34, %39, %44, %49, %53, %58, %63, %68, %73 in 0 : vector<4x256xf32>, vector<4x256xf32>, vector<4x256xf32>, vector<4x256xf32>, vector<4x256xf32>, vector<4x256xf32>, vector<4x256xf32>, vector<4x256xf32>, vector<4x256xf32> -> vector<36x256xf32>
    %c0_21 = arith.constant 0 : index
    %c0_22 = arith.constant 0 : index
    %75 = vector.load %arg3[%c0_21, %c0_22] : memref<8x36xf32, #tpu.memory_space<vmem>>, vector<8x36xf32>
    %cst_23 = arith.constant dense<0.000000e+00> : vector<8x256xf32>
    %76 = tpu.matmul %75, %74, %cst_23 {dimension_numbers = #tpu.dot_dimension_numbers<[1], [0], [0], [1], [0, 0, 1, 1], [], []>} : vector<8x36xf32>, vector<36x256xf32>, vector<8x256xf32> -> vector<8x256xf32>
    %c0_24 = arith.constant 0 : index
    %c0_25 = arith.constant 0 : index
    %77 = vector.load %arg4[%c0_24, %c0_25] : memref<8x1xf32, #tpu.memory_space<vmem>>, vector<8x1xf32>
    %78 = vector.broadcast %77 : vector<8x1xf32> to vector<8x256xf32>
    %79 = arith.addf %76, %78 : vector<8x256xf32>
    %cst_26 = arith.constant 0.000000e+00 : f32
    %80 = vector.broadcast %cst_26 : f32 to vector<8x256xf32>
    %81 = arith.cmpf ogt, %79, %80 : vector<8x256xf32>
    %cst_27 = arith.constant 0.000000e+00 : f32
    %82 = vector.broadcast %cst_27 : f32 to vector<8x256xf32>
    %83 = arith.minimumf %79, %82 : vector<8x256xf32>
    %84 = math.exp %83 : vector<8x256xf32>
    %cst_28 = arith.constant 1.000000e+00 : f32
    %85 = vector.broadcast %cst_28 : f32 to vector<8x256xf32>
    %86 = arith.subf %84, %85 : vector<8x256xf32>
    %87 = arith.select %81, %79, %86 : vector<8x256xi1>, vector<8x256xf32>
    %c17_i32_29 = arith.constant 17 : i32
    %88 = tpu.dynamic_rotate %87 by %c17_i32_29 dim 1 : vector<8x256xf32>, i32 -> vector<8x256xf32>
    %cst_30 = arith.constant 0.000000e+00 : f32
    %89 = vector.shape_cast %3 : vector<1x256xi1> to vector<1x256xi1>
    %90 = vector.broadcast %89 : vector<1x256xi1> to vector<8x256xi1>
    %91 = vector.broadcast %cst_30 : f32 to vector<8x256xf32>
    %92 = arith.select %90, %88, %91 : vector<8x256xi1>, vector<8x256xf32>
    %c16_i32_31 = arith.constant 16 : i32
    %93 = tpu.dynamic_rotate %87 by %c16_i32_31 dim 1 : vector<8x256xf32>, i32 -> vector<8x256xf32>
    %cst_32 = arith.constant 0.000000e+00 : f32
    %94 = vector.shape_cast %6 : vector<1x256xi1> to vector<1x256xi1>
    %95 = vector.broadcast %94 : vector<1x256xi1> to vector<8x256xi1>
    %96 = vector.broadcast %cst_32 : f32 to vector<8x256xf32>
    %97 = arith.select %95, %93, %96 : vector<8x256xi1>, vector<8x256xf32>
    %c15_i32_33 = arith.constant 15 : i32
    %98 = tpu.dynamic_rotate %87 by %c15_i32_33 dim 1 : vector<8x256xf32>, i32 -> vector<8x256xf32>
    %cst_34 = arith.constant 0.000000e+00 : f32
    %99 = vector.shape_cast %9 : vector<1x256xi1> to vector<1x256xi1>
    %100 = vector.broadcast %99 : vector<1x256xi1> to vector<8x256xi1>
    %101 = vector.broadcast %cst_34 : f32 to vector<8x256xf32>
    %102 = arith.select %100, %98, %101 : vector<8x256xi1>, vector<8x256xf32>
    %c1_i32_35 = arith.constant 1 : i32
    %103 = tpu.dynamic_rotate %87 by %c1_i32_35 dim 1 : vector<8x256xf32>, i32 -> vector<8x256xf32>
    %cst_36 = arith.constant 0.000000e+00 : f32
    %104 = vector.shape_cast %12 : vector<1x256xi1> to vector<1x256xi1>
    %105 = vector.broadcast %104 : vector<1x256xi1> to vector<8x256xi1>
    %106 = vector.broadcast %cst_36 : f32 to vector<8x256xf32>
    %107 = arith.select %105, %103, %106 : vector<8x256xi1>, vector<8x256xf32>
    %cst_37 = arith.constant 0.000000e+00 : f32
    %108 = vector.shape_cast %15 : vector<1x256xi1> to vector<1x256xi1>
    %109 = vector.broadcast %108 : vector<1x256xi1> to vector<8x256xi1>
    %110 = vector.broadcast %cst_37 : f32 to vector<8x256xf32>
    %111 = arith.select %109, %87, %110 : vector<8x256xi1>, vector<8x256xf32>
    %c255_i32_38 = arith.constant 255 : i32
    %112 = tpu.dynamic_rotate %87 by %c255_i32_38 dim 1 : vector<8x256xf32>, i32 -> vector<8x256xf32>
    %cst_39 = arith.constant 0.000000e+00 : f32
    %113 = vector.shape_cast %18 : vector<1x256xi1> to vector<1x256xi1>
    %114 = vector.broadcast %113 : vector<1x256xi1> to vector<8x256xi1>
    %115 = vector.broadcast %cst_39 : f32 to vector<8x256xf32>
    %116 = arith.select %114, %112, %115 : vector<8x256xi1>, vector<8x256xf32>
    %c241_i32_40 = arith.constant 241 : i32
    %117 = tpu.dynamic_rotate %87 by %c241_i32_40 dim 1 : vector<8x256xf32>, i32 -> vector<8x256xf32>
    %cst_41 = arith.constant 0.000000e+00 : f32
    %118 = vector.shape_cast %21 : vector<1x256xi1> to vector<1x256xi1>
    %119 = vector.broadcast %118 : vector<1x256xi1> to vector<8x256xi1>
    %120 = vector.broadcast %cst_41 : f32 to vector<8x256xf32>
    %121 = arith.select %119, %117, %120 : vector<8x256xi1>, vector<8x256xf32>
    %c240_i32_42 = arith.constant 240 : i32
    %122 = tpu.dynamic_rotate %87 by %c240_i32_42 dim 1 : vector<8x256xf32>, i32 -> vector<8x256xf32>
    %cst_43 = arith.constant 0.000000e+00 : f32
    %123 = vector.shape_cast %24 : vector<1x256xi1> to vector<1x256xi1>
    %124 = vector.broadcast %123 : vector<1x256xi1> to vector<8x256xi1>
    %125 = vector.broadcast %cst_43 : f32 to vector<8x256xf32>
    %126 = arith.select %124, %122, %125 : vector<8x256xi1>, vector<8x256xf32>
    %c239_i32_44 = arith.constant 239 : i32
    %127 = tpu.dynamic_rotate %87 by %c239_i32_44 dim 1 : vector<8x256xf32>, i32 -> vector<8x256xf32>
    %cst_45 = arith.constant 0.000000e+00 : f32
    %128 = vector.shape_cast %27 : vector<1x256xi1> to vector<1x256xi1>
    %129 = vector.broadcast %128 : vector<1x256xi1> to vector<8x256xi1>
    %130 = vector.broadcast %cst_45 : f32 to vector<8x256xf32>
    %131 = arith.select %129, %127, %130 : vector<8x256xi1>, vector<8x256xf32>
    %132 = tpu.concatenate %92, %97, %102, %107, %111, %116, %121, %126, %131 in 0 : vector<8x256xf32>, vector<8x256xf32>, vector<8x256xf32>, vector<8x256xf32>, vector<8x256xf32>, vector<8x256xf32>, vector<8x256xf32>, vector<8x256xf32>, vector<8x256xf32> -> vector<72x256xf32>
    %c0_46 = arith.constant 0 : index
    %c0_47 = arith.constant 0 : index
    %133 = vector.load %arg5[%c0_46, %c0_47] : memref<8x72xf32, #tpu.memory_space<vmem>>, vector<8x72xf32>
    %cst_48 = arith.constant dense<0.000000e+00> : vector<8x256xf32>
    %134 = tpu.matmul %133, %132, %cst_48 {dimension_numbers = #tpu.dot_dimension_numbers<[1], [0], [0], [1], [0, 0, 1, 1], [], []>} : vector<8x72xf32>, vector<72x256xf32>, vector<8x256xf32> -> vector<8x256xf32>
    %c0_49 = arith.constant 0 : index
    %c0_50 = arith.constant 0 : index
    %135 = vector.load %arg6[%c0_49, %c0_50] : memref<8x1xf32, #tpu.memory_space<vmem>>, vector<8x1xf32>
    %136 = vector.broadcast %135 : vector<8x1xf32> to vector<8x256xf32>
    %137 = arith.addf %134, %136 : vector<8x256xf32>
    %cst_51 = arith.constant 0.000000e+00 : f32
    %138 = vector.broadcast %cst_51 : f32 to vector<8x256xf32>
    %139 = arith.cmpf ogt, %137, %138 : vector<8x256xf32>
    %cst_52 = arith.constant 0.000000e+00 : f32
    %140 = vector.broadcast %cst_52 : f32 to vector<8x256xf32>
    %141 = arith.minimumf %137, %140 : vector<8x256xf32>
    %142 = math.exp %141 : vector<8x256xf32>
    %cst_53 = arith.constant 1.000000e+00 : f32
    %143 = vector.broadcast %cst_53 : f32 to vector<8x256xf32>
    %144 = arith.subf %142, %143 : vector<8x256xf32>
    %145 = arith.select %139, %137, %144 : vector<8x256xi1>, vector<8x256xf32>
    %c0_54 = arith.constant 0 : index
    %c0_55 = arith.constant 0 : index
    %c0_56 = arith.constant 0 : index
    %146 = vector.load %arg7[%c0_54, %c0_55, %c0_56] : memref<1x8x256xf32, #tpu.memory_space<vmem>>, vector<1x8x256xf32>
    %147 = vector.shape_cast %146 : vector<1x8x256xf32> to vector<8x256xf32>
    %148 = vector.shape_cast %145 : vector<8x256xf32> to vector<1x8x256xf32>
    tpu.vector_store %arg7[%c0_54, %c0_55, %c0_56], %148 {strides = array<i32>} : memref<1x8x256xf32, #tpu.memory_space<vmem>>, vector<1x8x256xf32>,
    return
  }
  func.func @transform_0(%arg0: i32) -> (i32, i32) {
    %c0_i32 = arith.constant 0 : i32
    %c0_i32_0 = arith.constant 0 : i32
    %c0_i32_1 = arith.constant 0 : i32
    return %c0_i32, %c0_i32_0 : i32, i32
  }
  func.func @transform_1(%arg0: i32) -> (i32, i32, i32) {
    %c0_i32 = arith.constant 0 : i32
    %c0_i32_0 = arith.constant 0 : i32
    %c0_i32_1 = arith.constant 0 : i32
    return %arg0, %c0_i32, %c0_i32_0 : i32, i32, i32
  }
  func.func @transform_2(%arg0: i32) -> (i32, i32) {
    %c0_i32 = arith.constant 0 : i32
    %c0_i32_0 = arith.constant 0 : i32
    %c0_i32_1 = arith.constant 0 : i32
    return %c0_i32, %c0_i32_0 : i32, i32
  }
  func.func @transform_3(%arg0: i32) -> (i32, i32) {
    %c0_i32 = arith.constant 0 : i32
    %c0_i32_0 = arith.constant 0 : i32
    %c0_i32_1 = arith.constant 0 : i32
    return %c0_i32, %c0_i32_0 : i32, i32
  }
  func.func @transform_4(%arg0: i32) -> (i32, i32) {
    %c0_i32 = arith.constant 0 : i32
    %c0_i32_0 = arith.constant 0 : i32
    %c0_i32_1 = arith.constant 0 : i32
    return %c0_i32, %c0_i32_0 : i32, i32
  }
  func.func @transform_5(%arg0: i32) -> (i32, i32) {
    %c0_i32 = arith.constant 0 : i32
    %c0_i32_0 = arith.constant 0 : i32
    %c0_i32_1 = arith.constant 0 : i32
    return %c0_i32, %c0_i32_0 : i32, i32
  }
  func.func @transform_6(%arg0: i32) -> (i32, i32, i32) {
    %c0_i32 = arith.constant 0 : i32
    %c0_i32_0 = arith.constant 0 : i32
    %c0_i32_1 = arith.constant 0 : i32
    return %arg0, %c0_i32, %c0_i32_0 : i32, i32, i32
  }
}

</mosaic_0001>

<bundles_post_ra>
// kernel: inconv_forward.1
= control target key start
LH: loop header
LB: loop body
LE: loop exit
PB: predicated region body
PF: predicated region fallthrough
CT: control target
= control target key end

     0   :  { %s1007_s21 = smov 0   ;;  %s1324_s0 = inlined_call_operand.vmem [shape: f32[9,256], index: 0, kind: input, shape index: {}]   ;;  %s1325_s1 = inlined_call_operand.vmem [shape: f32[2,4,256], index: 1, kind: input, shape index: {}]   ;;  %s1326_s2 = inlined_call_operand.vmem [shape: f32[8,36], index: 2, kind: input, shape index: {}]   ;;  %s1327_s3 = inlined_call_operand.vmem [shape: f32[8,1], index: 3, kind: input, shape index: {}]   ;;  %s1328_s4 = inlined_call_operand.vmem [shape: f32[8,72], index: 4, kind: input, shape index: {}]   ;;  %s1329_s5 = inlined_call_operand.vmem [shape: f32[8,1], index: 5, kind: input, shape index: {}]   ;;  %s1330_s6 = inlined_call_operand.vmem [shape: f32[2,8,256], index: 6, kind: output, shape index: {}]  }
   0x1 LB: > { %s784_s22 = sadd.s32 4294967295, %s960_s21   ;;  %p788_p0 = scmp.ge.s32.totalorder %s960_s21, 1  ;;  %s960_s21 = sphi %s1007_s21, %s16_s21  }
   0x2   : > { %p212_p1 = scmp.lt.s32.totalorder %s960_s21, 3 }
   0x4   : > { %p213_p2 = pnand %p788_p0, %p212_p1 }
   0x5   : > { %p242_p3 = scmp.lt.s32.totalorder (!%p213_p2), %s784_s22, 1  ;;  %v962_v0 = vmov (!%p213_p2), 0   ;;  %s963_s27 = smov (!%p213_p2), 16   ;;  %v971_v4 = vmov (!%p213_p2), 0.0   ;;  %v468_v5 = vld [vmem:[%s1327_s3] sm:$0xff] (!%p213_p2)  ;;  %v268_v6 = vlaneseq (!%p213_p2)  ;;  %v253_v7 = vld [vmem:[%s1324_s0 + $0x8] sm:$0xff] (!%p213_p2) }
   0x6   : > { %216 = sbr.rel (%p213_p2) target bundleno = 770 (0x302), region = 44  ;;  %908 = vset.pattern.permute.xlu1 (!%p213_p2), %v962_v0  ;;  %944 = vset.pattern.permute.xlu0 (!%p213_p2), %v962_v0  ;;  %s964_s28 = smov (!%p213_p2), 17   ;;  %v252_v9 = vld [vmem:[%s1324_s0] sm:$0xff] (!%p213_p2)  ;;  %vm257_vm0 = vcmp.gt.f32.partialorder (!%p213_p2), %v253_v7, 0.0  ;;  %v255_v32 = vld [vmem:[%s1324_s0 + $0x18] sm:$0x1] (!%p213_p2) }
   0x7   : > { %s965_s29 = smov (!%p213_p2), 1   ;;  %s966_s30 = smov (!%p213_p2), 15   ;;  %548 = vmatprep.mubr.f32.mxu0 (!%p213_p2), %v971_v4  ;;  %708 = vmatprep.mubr.f32.mxu1 (!%p213_p2), %v971_v4  ;;  %v276_v8 = vshrl.u32 (!%p213_p2), %v268_v6, 7  ;;  %v1051_v10 = vand.u32 (!%p213_p2), 127, %v268_v6  ;;  %vm256_vm1 = vcmp.gt.f32.partialorder (!%p213_p2), %v252_v9, 0.0  ;;  %v274_v13 = vsel (!%p213_p2), %vm257_vm0, 1, %v962_v0 }
   0x8   : > { %s967_s7 = smov (!%p213_p2), 127   ;;  %s968_s8 = smov (!%p213_p2), 112   ;;  %v273_v18 = vsel (!%p213_p2), %vm256_vm1, 1, %v962_v0  ;;  %v254_v37 = vld [vmem:[%s1324_s0 + $0x10] sm:$0x1] (!%p213_p2)  ;;  %vm259_vm0 = vcmp.gt.f32.partialorder (!%p213_p2), %v255_v32, 0.0 }
   0x9   : > { %s969_s9 = smov (!%p213_p2), 113   ;;  %s970_s10 = smov (!%p213_p2), 111   ;;  %v1053_v11 = vsub.s32 (!%p213_p2), 0, %v276_v8  ;;  %v296_v12 = vsub.s32 (!%p213_p2), 1, %v276_v8  ;;  %v315_v14 = vsub.s32 (!%p213_p2), 2, %v276_v8  ;;  %v346_v15 = vsub.s32 (!%p213_p2), 4, %v276_v8 }
   0xa   : > { %v365_v16 = vsub.s32 (!%p213_p2), 5, %v276_v8  ;;  %v334_v17 = vsub.s32 (!%p213_p2), 3, %v276_v8  ;;  %v403_v19 = vsub.s32 (!%p213_p2), 7, %v276_v8  ;;  %vm1336_vm2 = vcmp.lt.s32.totalorder (!%p213_p2), %v1051_v10, 16 }
   0xb   : > { %v282_v20 = vrot.slane (!%p213_p2), %v274_v13, %v1053_v11  ;;  %v1059_v21 = vrot.slane (!%p213_p2), %v274_v13, %v296_v12  ;;  %vm1337_vm3 = vcmp.lt.s32.totalorder (!%p213_p2), %v1051_v10, 17  ;;  %v1062_v22 = vrot.slane (!%p213_p2), %v274_v13, %v315_v14 }
   0xc   : > { %v278_v23 = vrot.slane (!%p213_p2), %v273_v18, %v1053_v11  ;;  %v1065_v24 = vrot.slane (!%p213_p2), %v274_v13, %v346_v15  ;;  %vm1335_vm4 = vcmp.lt.s32.totalorder (!%p213_p2), %v1051_v10, 1  ;;  %v1068_v25 = vrot.slane (!%p213_p2), %v273_v18, %v365_v16 }
   0xd   : > { %s1384_s22 = smov (!%p242_p3, %s784_s22), 1  ;;  %v1070_v26 = vrot.slane %v274_v13, %v334_v17  ;;  %v1072_v27 = vrot.slane %v273_v18, %v296_v12  ;;  %v1074_v28 = vrot.slane %v273_v18, %v334_v17  ;;  %v1076_v29 = vrot.slane %v274_v13, %v365_v16 }
   0xe   : > { %s821_s23 = sshll.u32 %s1384_s22, 3  ;;  %v1078_v30 = vrot.slane %v273_v18, %v403_v19  ;;  %v1080_v31 = vrot.slane %v274_v13, %v403_v19  ;;  %vm1086_vm6 = vcmp.eq.s32.totalorder %v282_v20, 1  ;;  %vm1333_vm7 = vcmp.eq.s32.totalorder %v1059_v21, 1 }
   0xf   : > { %s246_s26 = scalar_lea.vmem %s1325_s1, %s821_s23  ;;  %v1091_v34 = vrot.slane %v273_v18, %v315_v14  ;;  %v384_v35 = vsub.s32 6, %v276_v8  ;;  %vm1094_vm9 = vcmp.eq.s32.totalorder %v278_v23, 1  ;;  %vm1331_vm10 = vcmp.eq.s32.totalorder %v1065_v24, 1 }
  0x10   : > { %v1023_v1 = vld [vmem:[%s246_s26] sm:$0xff]  ;;  %v1102_v38 = vrot.slane %v273_v18, %v346_v15  ;;  %vm1332_vm14 = vcmp.eq.s32.totalorder %v1072_v27, 1  ;;  %vm371_vm1 = vcmp.eq.s32.totalorder %v1068_v25, 1  ;;  %vm372_vm8 = vcmp.eq.s32.totalorder %v1076_v29, 1 }
  0x11   : > { %v1027_v2 = vcombine.high %v1023_v1, %v1023_v1  ;;  %vm1338_vm5 = vcmp.eq.s32.totalorder %v1078_v30, 1  ;;  %vm410_vm11 = vcmp.eq.s32.totalorder %v1080_v31, 1  ;;  %vm458_vm12 = vcmask 1043456   ;;  %v633_v31 = vld [vmem:[%s1328_s4] sm:$0xff] }
  0x12   : > { %v1119_v46 = vrot.slane %v274_v13, %v384_v35  ;;  %vm258_vm15 = vcmp.gt.f32.partialorder %v254_v37, 0.0  ;;  %v1121_v47 = vrot.slane %v273_v18, %v384_v35  ;;  %v1129_v50 = vsel %vm259_vm0, 1, %v962_v0 }
  0x13   : > { %v873_v3 = vpack.i.bf16 %v1027_v2, %v1023_v1  ;;  %v1117_v45 = vsel %vm1331_vm10, %v1027_v2, 0.0  ;;  %vm1334_vm13 = vcmp.eq.s32.totalorder %v1102_v38, 1  ;;  %vm379_vm0 = vcmp.lt.s32.totalorder %v1051_v10, 113 }
  0x14   : > { %vm391_vm10 = vcmp.eq.s32.totalorder %v1119_v46, 1  ;;  %v1144_v61 = vsel %vm258_vm15, 1, %v962_v0  ;;  %v429_v62 = vrot.slane %v1129_v50, %v1053_v11  ;;  %v354_v63 = vsel %vm1334_vm13, %v1023_v1, 0.0 }
  0x15   : > { %874 = vrot.lane.b32.xlu0 %v873_v3, %s963_s27  ;;  %884 = vrot.lane.b32.xlu1 %v873_v3, %s964_s28  ;;  %vm1346_vm13 = vcmp.eq.s32.totalorder %v1062_v22, 1 }
  0x19   : > { %879 = vrot.lane.b32.xlu0 %v873_v3, %s965_s29  ;;  %889 = vrot.lane.b32.xlu1 %v873_v3, %s966_s30 }
  0x1d   : > { %894 = vrot.lane.b32.xlu0 %v873_v3, %s967_s7  ;;  %899 = vrot.lane.b32.xlu1 %v873_v3, %s968_s8 }
  0x21   : > { %904 = vrot.lane.b32.xlu0 %v873_v3, %s969_s9  ;;  %413 = vrot.lane.b32.xlu1 %v1023_v1, %s970_s10 }
  0x25   : > { %415 = vrot.lane.b32.xlu0 %v1027_v2, %s970_s10  ;;  %471 = vperm.xlu1 %908, %v468_v5  }
  0x87   : > { %v875_v39 = vpop.permute.xlu0 %874  ;;  %v885_v40 = vpop.permute.xlu1 %884 }
  0x88   : > { %v877_v41 = vunpack.i.h.bf16 %v875_v39  ;;  %v876_v42 = vunpack.i.l.bf16 %v875_v39  ;;  %v887_v43 = vunpack.i.h.bf16 %v885_v40  ;;  %v886_v44 = vunpack.i.l.bf16 %v885_v40 }
  0x8a   : > { %v292_v48 = vsel %vm1336_vm2, %v876_v42, %v877_v41  ;;  %v293_v49 = vsel %vm1336_vm2, %v877_v41, %v876_v42  ;;  %v271_v53 = vsel %vm1337_vm3, %v886_v44, %v887_v43  ;;  %v272_v55 = vsel %vm1337_vm3, %v887_v43, %v886_v44 }
  0x8b   : > { %v880_v51 = vpop.permute.xlu0 %879  ;;  %v890_v52 = vpop.permute.xlu1 %889  ;;  %v305_v54 = vsel %vm1333_vm7, %v292_v48, 0.0  ;;  %v304_v56 = vsel %vm1332_vm14, %v293_v49, 0.0  ;;  %v286_v4 = vsel %vm1086_vm6, %v271_v53, 0.0  ;;  %vm1344_vm14 = vcmp.lt.s32.totalorder %v1051_v10, 15 }
  0x8c   : > { %v882_v57 = vunpack.i.h.bf16 %v880_v51  ;;  %v881_v58 = vunpack.i.l.bf16 %v880_v51  ;;  %v892_v59 = vunpack.i.h.bf16 %v890_v52  ;;  %v891_v60 = vunpack.i.l.bf16 %v890_v52 }
  0x8d   : > { %vm1345_vm7 = vcmp.eq.s32.totalorder %v1070_v26, 1  ;;  %v437_v1 = vrot.slane %v305_v54, 4  ;;  %v285_v8 = vsel %vm1094_vm9, %v272_v55, 0.0  ;;  %v436_v9 = vrot.slane %v304_v56, 4 }
  0x8e   : > { %v330_v2 = vsel %vm1335_vm4, %v881_v58, %v882_v57  ;;  %v331_v3 = vsel %vm1335_vm4, %v882_v57, %v881_v58  ;;  %v311_v0 = vsel %vm1344_vm14, %v891_v60, %v892_v59  ;;  %v312_v18 = vsel %vm1344_vm14, %v892_v59, %v891_v60 }
  0x8f   : > { %v895_v5 = vpop.permute.xlu0 %894  ;;  %v900_v6 = vpop.permute.xlu1 %899  ;;  %v343_v7 = vsel %vm1345_vm7, %v330_v2, 0.0  ;;  %v324_v16 = vsel %vm1346_vm13, %v311_v0, 0.0  ;;  %vm1347_vm4 = vcmp.eq.s32.totalorder %v1074_v28, 1  ;;  %vm1348_vm7 = vcmp.lt.s32.totalorder %v1051_v10, 127 }
  0x90   : > { %v897_v12 = vunpack.i.h.bf16 %v895_v5  ;;  %v896_v13 = vunpack.i.l.bf16 %v895_v5  ;;  %v902_v14 = vunpack.i.h.bf16 %v900_v6  ;;  %v901_v15 = vunpack.i.l.bf16 %v900_v6  ;;  %vm1349_vm2 = vmmov %vm1348_vm7 }
  0x91   : > { %v443_v17 = vrot.slane %v343_v7, 4  ;;  %v342_v19 = vsel %vm1347_vm4, %v331_v3, 0.0  ;;  %vm1350_vm3 = vcmp.lt.s32.totalorder %v1051_v10, 112  ;;  %v460_v48 = vsel %vm458_vm12, %v286_v4, %v437_v1 }
  0x92   : > { %v361_v20 = vsel %vm1348_vm7, %v896_v13, %v897_v12  ;;  %v362_v23 = vsel %vm1349_vm2, %v897_v12, %v896_v13  ;;  %v399_v32 = vsel %vm1350_vm3, %v901_v15, %v902_v14  ;;  %vm1351_vm15 = vmmov %vm1350_vm3  ;;  %vm1352_vm2 = vcmp.eq.s32.totalorder %v1091_v34, 1 }
  0x93   : > { %v400_v35 = vsel %vm1351_vm15, %v902_v14, %v901_v15  ;;  %v373_v37 = vsel %vm371_vm1, %v361_v20, 0.0  ;;  %v374_v39 = vsel %vm372_vm8, %v362_v23, 0.0  ;;  %v411_v40 = vsel %vm1338_vm5, %v399_v32, 0.0  ;;  %v905_v42 = vpop.permute.xlu0 %904  ;;  %v414_v57 = vpop.permute.xlu1 %413 }
  0x94   : > { %v412_v41 = vsel %vm410_vm11, %v400_v35, 0.0  ;;  %v449_v43 = vrot.slane %v374_v39, 4  ;;  %v323_v49 = vsel %vm1352_vm2, %v312_v18, 0.0  ;;  %v907_v50 = vunpack.i.h.bf16 %v905_v42 }
  0x95   : > { %v455_v44 = vrot.slane %v412_v41, 4  ;;  %v906_v51 = vunpack.i.l.bf16 %v905_v42  ;;  %v462_v52 = vsel %vm458_vm12, %v324_v16, %v443_v17  ;;  %v442_v53 = vrot.slane %v342_v19, 4 }
  0x96   : > { %v448_v54 = vrot.slane %v373_v37, 4  ;;  %v454_v55 = vrot.slane %v411_v40, 4  ;;  %v823_v56 = vpack.c.bf16 %v462_v52, %v460_v48  ;;  %vm1339_vm3 = vcmp.eq.s32.totalorder %v1121_v47, 1 }
  0x97   : > { %v380_v58 = vsel %vm379_vm0, %v906_v51, %v907_v50  ;;  %v381_v59 = vsel %vm379_vm0, %v907_v50, %v906_v51  ;;  %v459_v60 = vsel %vm458_vm12, %v285_v8, %v436_v9  ;;  %v461_v2 = vsel %vm458_vm12, %v323_v49, %v442_v53  ;;  %v416_v3 = vpop.permute.xlu0 %415  ;;  %v634_v49 = vld [vmem:[%s1329_s5] sm:$0xff] }
  0x98   : > { %824 = vmatprep.subr.bf16.mxu0 %v823_v56  ;;  %v825_v4 = vpack.c.bf16 %v461_v2, %v459_v60  ;;  %v393_v0 = vsel %vm391_vm10, %v381_v59, 0.0  ;;  %v425_v5 = vrot.slane %v1144_v61, %v1053_v11  ;;  %vm1201_vm4 = vcmp.eq.s32.totalorder %v429_v62, 1 }
  0x99   : > { %v464_v7 = vsel %vm458_vm12, %v1117_v45, %v449_v43  ;;  %v466_v1 = vsel %vm458_vm12, %v393_v0, %v455_v44  ;;  %vm1355_vm13 = vcmp.lt.s32.totalorder %v1051_v10, 111  ;;  %v392_v9 = vsel %vm1339_vm3, %v380_v58, 0.0 }
  0x9a   : > { %v419_v8 = vsel %vm1355_vm13, %v416_v3, %v414_v57  ;;  %826 = vmatpush1.bf16.msra.mxu0 %v825_v4  ;;  %v827_v12 = vpack.c.bf16 %v466_v1, %v464_v7  ;;  %v463_v13 = vsel %vm458_vm12, %v354_v63, %v448_v54  ;;  %v465_v11 = vsel %vm458_vm12, %v392_v9, %v454_v55  ;;  %vm1358_vm14 = vmmov %vm1355_vm13  ;;  %v467_v63 = vld [vmem:[%s1326_s2] sm:$0xff] }
  0x9b   : > { %v829_v61 = vpack.c.bf16 %v465_v11, %v463_v13  ;;  %vm1214_vm15 = vcmp.eq.s32.totalorder %v425_v5, 1  ;;  %v418_v45 = vsel %vm1358_vm14, %v414_v57, %v416_v3  ;;  %v433_v14 = vsel %vm1201_vm4, %v419_v8, 0.0 }
  0x9c   : > { %828 = vmatprep.subr.bf16.mxu0 %v827_v12  ;;  %v432_v15 = vsel %vm1214_vm15, %v418_v45, 0.0  ;;  %vm474_vm7 = vcmask 293888   ;;  %vm1359_vm13 = vcmp.lt.s32.totalorder %v1051_v10, 17  ;;  %vm1360_vm14 = vcmp.lt.s32.totalorder %v1051_v10, 16 }
  0x9d   : > { %vm1363_vm5 = vmmov %vm1360_vm14 }
  0x9e   : > { %830 = vmatpush1.bf16.msra.mxu0 %v829_v61 }
  0x9f   : > { %793 = vmatprep.subr.msk.mxu0 %vm458_vm12, %v433_v14 }
  0xa2   : > { %794 = vmatpush1.msk.msra.mxu0 %vm458_vm12, %v432_v15 }
  0xa3   : > { %795 = vmatmul.mubr.msk.f32.vlgmr.msra.gmra.mrb[0].mxu0 %vm474_vm7, %v467_v63  ;;  %vm1361_vm7 = vcmp.eq.s32.totalorder %v1059_v21, 1 }
  0xa4   : > { %v472_v16 = vpop.permute.xlu1 %471 }
 0x176   : > { %v550_v17 = vpop.f32.mrb[0].mxu0 }
 0x177   : > { %v551_v18 = vadd.f32 %v550_v17, %v472_v16  ;;  %v552_v19 = vpop.f32.mrb[1].mxu0 }
 0x178   : > { %v553_v20 = vadd.f32 %v552_v19, %v472_v16 }
 0x179   : > { %v557_v23 = vmin.f32 %v551_v18, 0.0  ;;  %vm555_vm2 = vcmp.gt.f32.partialorder %v551_v18, 0.0 }
 0x17a   : > { %v558_v32 = vmin.f32 %v553_v20, 0.0  ;;  %vm556_vm12 = vcmp.gt.f32.partialorder %v553_v20, 0.0 }
 0x17b   : > { %v559_v35 = vmul.f32 1.442695, %v557_v23 }
 0x17c   : > { %v561_v37 = vmul.f32 1.442695, %v558_v32 }
 0x17d   : > { %946 = vpow2.f32 %v559_v35 }
 0x17e   : > { %948 = vpow2.f32 %v561_v37 }
 0x187   : > { %v947_v39 = vpop.eup %946 }
 0x188   : > { %v949_v40 = vpop.eup %948  ;;  %v796_v41 = vadd.f32 -1.0, %v947_v39 }
 0x189   : > { %v797_v42 = vadd.f32 -1.0, %v949_v40 }
 0x18a   : > { %v1229_v43 = vsel %vm555_vm2, %v551_v18, %v796_v41  ;;  %vm832_vm2 = vmpackc.low %vm1361_vm7, %vm1086_vm6  ;;  %vm1365_vm6 = vcmp.lt.s32.totalorder %v1051_v10, 1 }
 0x18b   : > { %v566_v44 = vsel %vm556_vm12, %v553_v20, %v797_v42  ;;  %vm1362_vm12 = vmmov %vm1359_vm13 }
 0x18c   : > { %v914_v48 = vpack.i.bf16 %v566_v44, %v1229_v43  ;;  %vm1366_vm7 = vmmov %vm1365_vm6 }
 0x18e   : > { %915 = vrot.lane.b32.xlu1 %v914_v48, %s963_s27  ;;  %910 = vrot.lane.b32.xlu0 %v914_v48, %s964_s28 }
 0x192   : > { %925 = vrot.lane.b32.xlu1 %v914_v48, %s965_s29  ;;  %920 = vrot.lane.b32.xlu0 %v914_v48, %s966_s30  ;;  %s822_s29 = sshll.u32 %s1384_s22, 4 }
 0x196   : > { %935 = vrot.lane.b32.xlu1 %v914_v48, %s969_s9  ;;  %930 = vrot.lane.b32.xlu0 %v914_v48, %s967_s7 }
 0x19a   : > { %625 = vrot.lane.b32.xlu1 %v1229_v43, %s970_s10  ;;  %940 = vrot.lane.b32.xlu0 %v914_v48, %s968_s8  ;;  %s251_s8 = scalar_lea.vmem %s1330_s6, %s822_s29 }
 0x19e   : > { %637 = vperm.xlu1 %908, %v634_v49   ;;  %627 = vrot.lane.b32.xlu0 %v566_v44, %s970_s10 }
 0x200   : > { %v916_v50 = vpop.permute.xlu1 %915  ;;  %v911_v51 = vpop.permute.xlu0 %910 }
 0x201   : > { %v918_v52 = vunpack.i.h.bf16 %v916_v50  ;;  %v917_v53 = vunpack.i.l.bf16 %v916_v50  ;;  %v913_v54 = vunpack.i.h.bf16 %v911_v51  ;;  %v912_v55 = vunpack.i.l.bf16 %v911_v51 }
 0x203   : > { %v571_v56 = vsel %vm1359_vm13, %v912_v55, %v913_v54  ;;  %v579_v57 = vsel %vm1360_vm14, %v917_v53, %v918_v52  ;;  %v572_v58 = vsel %vm1362_vm12, %v913_v54, %v912_v55  ;;  %v580_v59 = vsel %vm1363_vm5, %v918_v52, %v917_v53 }
 0x204   : > { %v926_v60 = vpop.permute.xlu1 %925  ;;  %v921_v2 = vpop.permute.xlu0 %920  ;;  %v831_v3 = vpack.c.bf16 %v579_v57, %v571_v56  ;;  %v834_v4 = vpack.c.bf16 %v580_v59, %v572_v58  ;;  %vm1364_vm13 = vcmp.eq.s32.totalorder %v1072_v27, 1  ;;  %vm1367_vm5 = vcmp.lt.s32.totalorder %v1051_v10, 15 }
 0x205   : > { %vm835_vm14 = vmpackc.low %vm1364_vm13, %vm1094_vm9  ;;  %v928_v0 = vunpack.i.h.bf16 %v926_v60  ;;  %v927_v33 = vunpack.i.l.bf16 %v926_v60  ;;  %v923_v5 = vunpack.i.h.bf16 %v921_v2  ;;  %v922_v21 = vunpack.i.l.bf16 %v921_v2 }
 0x206   : > { %833 = vmatprep.subr.msk.bf16.mxu1 %vm832_vm2, %v831_v3  ;;  %vm1368_vm12 = vmmov %vm1367_vm5  ;;  %vm1369_vm9 = vcmp.eq.s32.totalorder %v1062_v22, 1  ;;  %vm1370_vm13 = vcmp.eq.s32.totalorder %v1070_v26, 1  ;;  %vm1371_vm2 = vcmp.eq.s32.totalorder %v1091_v34, 1 }
 0x207   : > { %v595_v7 = vsel %vm1365_vm6, %v927_v33, %v928_v0  ;;  %v596_v1 = vsel %vm1366_vm7, %v928_v0, %v927_v33  ;;  %v587_v8 = vsel %vm1367_vm5, %v922_v21, %v923_v5  ;;  %v588_v36 = vsel %vm1368_vm12, %v923_v5, %v922_v21  ;;  %836 = vmatpush1.bf16.msk.msra.mxu1 %vm835_vm14, %v834_v4  ;;  %vm838_vm3 = vmpackc.low %vm1370_vm13, %vm1369_vm9 }
 0x208   : > { %v837_v27 = vpack.c.bf16 %v595_v7, %v587_v8  ;;  %v840_v9 = vpack.c.bf16 %v596_v1, %v588_v36  ;;  %v936_v12 = vpop.permute.xlu1 %935  ;;  %v931_v13 = vpop.permute.xlu0 %930  ;;  %vm1372_vm6 = vcmp.eq.s32.totalorder %v1074_v28, 1  ;;  %vm1373_vm14 = vcmp.lt.s32.totalorder %v1051_v10, 127 }
 0x209   : > { %vm841_vm7 = vmpackc.low %vm1372_vm6, %vm1371_vm2  ;;  %v933_v11 = vunpack.i.h.bf16 %v931_v13  ;;  %v932_v61 = vunpack.i.l.bf16 %v931_v13  ;;  %v938_v45 = vunpack.i.h.bf16 %v936_v12  ;;  %v937_v14 = vunpack.i.l.bf16 %v936_v12 }
 0x20a   : > { %839 = vmatprep.subr.msk.bf16.mxu1 %vm838_vm3, %v837_v27  ;;  %vm1374_vm5 = vmmov %vm1373_vm14  ;;  %vm1375_vm12 = vcmp.eq.s32.totalorder %v1065_v24, 1  ;;  %vm1376_vm3 = vcmp.eq.s32.totalorder %v1102_v38, 1  ;;  %vm1379_vm6 = vcmp.eq.s32.totalorder %v1121_v47, 1 }
 0x20b   : > { %v605_v22 = vsel %vm1373_vm14, %v932_v61, %v933_v11  ;;  %v606_v26 = vsel %vm1374_vm5, %v933_v11, %v932_v61  ;;  %842 = vmatpush1.bf16.msk.msra.mxu1 %vm841_vm7, %v840_v9  ;;  %vm844_vm9 = vmpackc.low %vm372_vm8, %vm1375_vm12  ;;  %v613_v17 = vsel %vm379_vm0, %v937_v14, %v938_v45  ;;  %v614_v24 = vsel %vm379_vm0, %v938_v45, %v937_v14 }
 0x20c   : > { %v843_v34 = vpack.c.bf16 %v606_v26, %v566_v44  ;;  %v846_v28 = vpack.c.bf16 %v605_v22, %v1229_v43  ;;  %v941_v15 = vpop.permute.xlu0 %940  ;;  %vm847_vm13 = vmpackc.low %vm371_vm1, %vm1376_vm3  ;;  %vm1377_vm8 = vcmp.lt.s32.totalorder %v1051_v10, 112  ;;  %vm1380_vm7 = vcmp.eq.s32.totalorder %v1078_v30, 1  ;;  %v626_v20 = vpop.permute.xlu1 %625 }
 0x20d   : > { %v943_v63 = vunpack.i.h.bf16 %v941_v15  ;;  %v942_v16 = vunpack.i.l.bf16 %v941_v15  ;;  %vm1378_vm2 = vmmov %vm1377_vm8  ;;  %vm1381_vm14 = vcmp.lt.s32.totalorder %v1051_v10, 111 }
 0x20e   : > { %845 = vmatprep.subr.msk.bf16.mxu1 %vm844_vm9, %v843_v34  ;;  %vm850_vm1 = vmpackc.low %vm410_vm11, %vm391_vm10  ;;  %vm640_vm10 = vcmask 588800  }
 0x20f   : > { %v621_v29 = vsel %vm1377_vm8, %v942_v16, %v943_v63  ;;  %v622_v18 = vsel %vm1378_vm2, %v943_v63, %v942_v16  ;;  %848 = vmatpush1.bf16.msk.msra.mxu1 %vm847_vm13, %v846_v28  ;;  %vm853_vm0 = vmpackc.low %vm1380_vm7, %vm1379_vm6 }
 0x210   : > { %v849_v25 = vpack.c.bf16 %v622_v18, %v614_v24  ;;  %v852_v38 = vpack.c.bf16 %v621_v29, %v613_v17  ;;  %v628_v19 = vpop.permute.xlu0 %627  ;;  %vm1382_vm11 = vmmov %vm1381_vm14 }
 0x211   : > { %v630_v23 = vsel %vm1381_vm14, %v628_v19, %v626_v20  ;;  %v629_v46 = vsel %vm1382_vm11, %v626_v20, %v628_v19 }
 0x212   : > { %851 = vmatprep.subr.msk.bf16.mxu1 %vm850_vm1, %v849_v25 }
 0x213   : > { %854 = vmatpush1.bf16.msk.msra.mxu1 %vm853_vm0, %v852_v38 }
 0x214   : > { %814 = vmatprep.subr.msk.mxu1 %vm1201_vm4, %v630_v23 }
 0x217   : > { %815 = vmatpush1.msk.msra.mxu1 %vm1214_vm15, %v629_v46 }
 0x218   : > { %816 = vmatmul.mubr.msk.f32.vlgmr.msra.gmra.mrb[0].mxu1 %vm640_vm10, %v633_v31 }
 0x21d   : > { %v638_v30 = vpop.permute.xlu1 %637 }
 0x2eb   : > { %v710_v47 = vpop.f32.mrb[0].mxu1 }
 0x2ec   : > { %v711_v32 = vadd.f32 %v710_v47, %v638_v30  ;;  %v712_v35 = vpop.f32.mrb[1].mxu1 }
 0x2ed   : > { %v713_v37 = vadd.f32 %v712_v35, %v638_v30 }
 0x2ee   : > { %v717_v6 = vmin.f32 %v711_v32, 0.0  ;;  %vm715_vm4 = vcmp.gt.f32.partialorder %v711_v32, 0.0 }
 0x2ef   : > { %v718_v39 = vmin.f32 %v713_v37, 0.0  ;;  %vm716_vm15 = vcmp.gt.f32.partialorder %v713_v37, 0.0 }
 0x2f0   : > { %v719_v40 = vmul.f32 1.442695, %v717_v6 }
 0x2f1   : > { %v721_v41 = vmul.f32 1.442695, %v718_v39 }
 0x2f2   : > { %950 = vpow2.f32 %v719_v40 }
 0x2f3   : > { %952 = vpow2.f32 %v721_v41 }
 0x2fc   : > { %v951_v42 = vpop.eup %950 }
 0x2fd   : > { %v953_v43 = vpop.eup %952  ;;  %v817_v10 = vadd.f32 -1.0, %v951_v42 }
 0x2fe   : > { %v818_v62 = vadd.f32 -1.0, %v953_v43 }
 0x2ff   : > { %v725_v44 = vsel %vm715_vm4, %v711_v32, %v817_v10 }
 0x300   : > { %727 = vst [vmem:[%s251_s8] sm:$0xff] %v725_v44  ;;  %v726_v48 = vsel %vm716_vm15, %v713_v37, %v818_v62 }
 0x301   : > { %728 = vst [vmem:[%s251_s8 + $0x8] sm:$0xff] %v726_v48 }
 0x302 PF: > { %s16_s21 = sadd.s32 1, %s960_s21  }
 0x303   : > { %p13_p4 = scmp.ge.s32.totalorder %s16_s21, 4  }
 0x305   :  { %15 = sbr.rel (!%p13_p4) target bundleno = 1 (0x1), region = 74 }

</bundles_post_ra>
